<compile_context>
chip_gen: v7x
topology: tpu7x:2x2x1
jax: 0.10.0
libtpu: 0.0.40
codegen_flags: <defaults>
</compile_context>

<pallas_src>
import functools

import jax
import jax.numpy as jnp
from jax.experimental import pallas as pl
from jax.experimental.pallas import tpu as pltpu

_MiB = 1024 * 1024


def _round_up(x, m):
    return (x + m - 1) // m * m


def _device_kind():
    try:
        return jax.devices()[0].device_kind.lower()
    except Exception:
        return ""


def _vmem_cap_bytes():
    """Scoped-VMEM clamp: <= 48 MiB and <= 75% of physical VMEM (v7x headroom)."""
    try:
        phys = pltpu.get_tpu_info().vmem_capacity_bytes
    except Exception:
        phys = 64 * _MiB
    return int(min(48 * _MiB, phys * 3 // 4))


def _emb_tile_budget_bytes(kind):
    """Budget for the double-buffered (TB, S, H_pad) bf16 embedding tile."""
    if "v6" in kind:
        return 32 * _MiB   # 128 MiB physical VMEM: bigger tiles amortize step overhead
    if "v7" in kind:
        return 20 * _MiB   # 64 MiB physical VMEM: leave headroom for weights/scratch
    return 16 * _MiB       # v5e / unknown: most constrained default


def _pick_batch_tiling(B, S, H_pad, budget_bytes, min_steps=4):
    """Pick (B_pad, TB).

    Prefers a multiple-of-8 batch tile (sublane-aligned valid_length / output
    blocks) that fits the double-buffered budget AND leaves >= min_steps grid
    steps (prefetch overlap + v7x megacore sharding).  Small batches fall back
    to one full-batch block (block == full dims is always legal); batches whose
    full slab would blow the budget are padded to a multiple of 8 and tiled by
    the smallest aligned tile instead of falling back to the full batch.
    """
    def db_bytes(tb):
        return 2 * tb * S * H_pad * 2   # double-buffered bf16 embedding tile

    if B % 8 == 0:
        cands = [tb for tb in range(8, B + 1, 8) if B % tb == 0]
        best = None
        for tb in cands:                       # largest aligned divisor, >= min_steps
            if db_bytes(tb) <= budget_bytes and B // tb >= min_steps:
                best = tb
        if best is None:                       # relax the step requirement
            for tb in cands:
                if db_bytes(tb) <= budget_bytes:
                    best = tb
        if best is None:                       # even TB=8 over budget: smallest aligned
            best = 8
        return B, best

    # B not a multiple of 8.
    if db_bytes(B) <= budget_bytes:
        return B, B                            # single full-batch block
    return _round_up(B, 8), 8                  # pad the batch, smallest aligned tile


def bert_classifier_head_kernel(vl_ref, emb_ref, wp_ref, bp_ref, wc_ref,
                                bc_ref, out_ref, *, use_mxu_pool):
    """One batch tile: mask -> masked mean pool -> pooler -> classifier."""
    TB, S, Hp = emb_ref.shape

    # --- gen_attention_mask: mask[b, s] = 1.0 if s < valid_length[b] else 0.0
    pos = jax.lax.broadcasted_iota(jnp.int32, (TB, S), 1)          # (TB, S)
    vl = vl_ref[...]                                               # (TB, 1) i32
    mask = (pos < vl).astype(jnp.bfloat16)                         # (TB, S)

    emb = emb_ref[...]                                             # (TB, S, Hp) bf16

    # --- surrogate BERT pooler: attention-masked mean over the sequence.
    if use_mxu_pool:
        # v5e / unknown: batched contraction over S on the MXU
        # (TB,1,S) x (TB,S,Hp) -> (TB,1,Hp); VPU there has no bf16.
        summed = jax.lax.dot_general(
            mask[:, None, :], emb,
            dimension_numbers=(((2,), (1,)), ((0,), (0,))),
            preferred_element_type=jnp.float32)[:, 0, :]           # (TB, Hp) f32
    else:
        # v6e/v7x: bf16 mask-multiply on the VPU + f32 reduce keeps the
        # poorly-shaped M=1 batched matmul off the MXU; accumulate in f32.
        summed = jnp.sum((emb * mask[:, :, None]).astype(jnp.float32),
                         axis=1)                                   # (TB, Hp) f32

    # Analytic token count; divide only the (TB,1) count, then broadcast-mul.
    count = jnp.clip(vl, 1, S).astype(jnp.float32)                 # (TB, 1)
    pooled = summed * (1.0 / count)                                # (TB, Hp) f32

    # pooler dense + tanh (BERT-style pooler head); bf16 MXU inputs, f32 acc.
    pre = jnp.dot(pooled.astype(jnp.bfloat16), wp_ref[...],
                  preferred_element_type=jnp.float32) + bp_ref[...]
    pooler = jnp.tanh(pre)                                         # (TB, Hp) f32

    # dropout(p=dr_rate) in eval mode == identity.

    # --- classifier: Linear(hidden_size, num_classes) (lane-dense padded C).
    logits = jnp.dot(pooler.astype(jnp.bfloat16), wc_ref[...],
                     preferred_element_type=jnp.float32) + bc_ref[...]
    out_ref[...] = logits                                          # (TB, Cp) f32


def _build_head_call(B_pad, TB, S, H_pad, C_pad, use_mxu_pool,
                     single_buffer_weights, vmem_cap):
    wbuf = 1 if single_buffer_weights else 2
    est = (2 * TB * S * H_pad * 2          # embeddings (bf16, double-buffered)
           + 2 * TB * 1 * 4                # valid_length
           + 2 * TB * C_pad * 4            # output block
           + wbuf * (H_pad * H_pad * 2 + H_pad * 4
                     + H_pad * C_pad * 2 + C_pad * 4))
    vmem_limit = int(min(max(2 * est, 16 * _MiB), vmem_cap))

    def weight_spec(shape):
        if single_buffer_weights:
            # Constant-index weights are fetched once; single-buffering them
            # reclaims VMEM for a larger embedding tile (matters on v7x).
            return pl.BlockSpec(shape, lambda i: (0, 0),
                                pipeline_mode=pl.Buffered(1))
        return pl.BlockSpec(shape, lambda i: (0, 0))

    kernel_fn = functools.partial(bert_classifier_head_kernel,
                                  use_mxu_pool=use_mxu_pool)
    return pl.pallas_call(
        kernel_fn,
        out_shape=jax.ShapeDtypeStruct((B_pad, C_pad), jnp.float32),
        grid=(B_pad // TB,),
        in_specs=[
            pl.BlockSpec((TB, 1), lambda i: (i, 0)),            # valid_length
            pl.BlockSpec((TB, S, H_pad), lambda i: (i, 0, 0)),  # embeddings
            weight_spec((H_pad, H_pad)),                        # pooler weight
            weight_spec((1, H_pad)),                            # pooler bias
            weight_spec((H_pad, C_pad)),                        # classifier weight
            weight_spec((1, C_pad)),                            # classifier bias
        ],
        out_specs=pl.BlockSpec((TB, C_pad), lambda i: (i, 0)),
        compiler_params=pltpu.CompilerParams(
            dimension_semantics=("parallel",),
            vmem_limit_bytes=vmem_limit),
    )


def prepare_params(params):
    """One-time prep: cast tables/weights to bf16 and pad to 128 lanes so the
    per-call wrapper does no full-slab pad/cast passes and every MXU operand /
    output block is lane-aligned."""
    H = params["w_pool"].shape[0]
    C = params["w_cls"].shape[1]
    H_pad = _round_up(H, 128)
    C_pad = _round_up(C, 128)
    padH = (0, H_pad - H)
    padC = (0, C_pad - C)
    return {
        "token_emb": jnp.pad(params["token_emb"].astype(jnp.bfloat16),
                             ((0, 0), padH)),                      # (V, Hp) bf16
        "seg_emb": jnp.pad(params["seg_emb"].astype(jnp.bfloat16),
                           ((0, 0), padH)),                        # (2, Hp) bf16
        "w_pool": jnp.pad(params["w_pool"].astype(jnp.bfloat16), (padH, padH)),
        "b_pool": jnp.pad(params["b_pool"].astype(jnp.float32), ((0, 0), padH)),
        "w_cls": jnp.pad(params["w_cls"].astype(jnp.bfloat16), (padH, padC)),
        "b_cls": jnp.pad(params["b_cls"].astype(jnp.float32), ((0, 0), padC)),
        "hidden_size": H,
        "num_classes": C,
    }


def bert_classifier_forward(token_ids, valid_length, segment_ids, prep):
    """Glue: bf16 embedding gather (already padded) + pallas_call of the head."""
    B, S = token_ids.shape
    H_pad = prep["w_pool"].shape[0]
    C_pad = prep["w_cls"].shape[1]
    C = prep["num_classes"]

    # Embedding gather (glue): tables are pre-padded/pre-cast bf16, so this
    # directly yields the padded bf16 (B,S,H_pad) slab -- no per-call pad/cast
    # passes over the dominant stream.
    # TODO(synk): fusing this gather into the kernel (scalar-prefetched ids,
    # HBM tables via memory_space=pl.ANY, per-row make_async_copy gather)
    # removes one more HBM round trip, but only pays off once H_pad*2 bytes
    # per row is >= ~1-2 KiB; at small H the per-row DMAs are latency bound.
    emb = (jnp.take(prep["token_emb"], token_ids, axis=0)
           + jnp.take(prep["seg_emb"], segment_ids, axis=0))       # (B,S,Hp) bf16
    vl = valid_length.reshape(B, 1).astype(jnp.int32)

    kind = _device_kind()
    use_mxu_pool = not ("v6" in kind or "v7" in kind)   # keep MXU pool on v5e/unknown
    B_pad, TB = _pick_batch_tiling(B, S, H_pad, _emb_tile_budget_bytes(kind))
    if B_pad != B:
        emb = jnp.pad(emb, ((0, B_pad - B), (0, 0), (0, 0)))
        vl = jnp.pad(vl, ((0, B_pad - B), (0, 0)))

    vmem_cap = _vmem_cap_bytes()
    args = (vl, emb, prep["w_pool"], prep["b_pool"], prep["w_cls"], prep["b_cls"])
    out = None
    for single_buffer_weights in (True, False):
        try:
            out = _build_head_call(B_pad, TB, S, H_pad, C_pad, use_mxu_pool,
                                   single_buffer_weights, vmem_cap)(*args)
            break
        except Exception:
            # pl.Buffered(1) support can vary across jax versions; fall back to
            # default (double-buffered) weight specs rather than failing.
            if not single_buffer_weights:
                raise
    return out[:B, :C]


def reference_forward(token_ids, valid_length, segment_ids, prep):
    """Pure-jnp reference mirroring the kernel's bf16 streaming / matmul inputs."""
    B, S = token_ids.shape
    C = prep["num_classes"]
    emb = (jnp.take(prep["token_emb"], token_ids, axis=0)
           + jnp.take(prep["seg_emb"], segment_ids, axis=0)).astype(jnp.float32)
    pos = jnp.arange(S)[None, :]
    mask = (pos < valid_length[:, None]).astype(jnp.float32)
    summed = jnp.einsum("bs,bsh->bh", mask, emb)
    count = jnp.clip(valid_length, 1, S).astype(jnp.float32)[:, None]
    pooled = summed * (1.0 / count)
    wp = prep["w_pool"].astype(jnp.float32)
    wc = prep["w_cls"].astype(jnp.float32)
    pooler = jnp.tanh(pooled.astype(jnp.bfloat16).astype(jnp.float32) @ wp
                      + prep["b_pool"])
    logits = (pooler.astype(jnp.bfloat16).astype(jnp.float32) @ wc
              + prep["b_cls"])
    return logits[:, :C]


if __name__ == "__main__":
    # Small shapes consistent with the module's forward.
    B, S, H, C, VOCAB = 2, 8, 32, 3, 64

    key = jax.random.PRNGKey(0)
    k_tok, k_seg, k_te, k_se, k_wp, k_bp, k_wc, k_bc = jax.random.split(key, 8)

    token_ids = jax.random.randint(k_tok, (B, S), 0, VOCAB, dtype=jnp.int32)
    segment_ids = jax.random.randint(k_seg, (B, S), 0, 2, dtype=jnp.int32)
    valid_length = jnp.array([5, 8], dtype=jnp.int32)

    params = {
        "token_emb": jax.random.normal(k_te, (VOCAB, H), jnp.float32) * 0.02,
        "seg_emb":   jax.random.normal(k_se, (2, H), jnp.float32) * 0.02,
        "w_pool":    jax.random.normal(k_wp, (H, H), jnp.float32) * 0.05,
        "b_pool":    jax.random.normal(k_bp, (1, H), jnp.float32) * 0.01,
        "w_cls":     jax.random.normal(k_wc, (H, C), jnp.float32) * 0.05,
        "b_cls":     jax.random.normal(k_bc, (1, C), jnp.float32) * 0.01,
    }
    prep = prepare_params(params)   # one-time pad/cast, not a per-call cost

    logits = jax.block_until_ready(
        bert_classifier_forward(token_ids, valid_length, segment_ids, prep))
    ref = jax.block_until_ready(
        reference_forward(token_ids, valid_length, segment_ids, prep))

    assert logits.shape == (B, C), logits.shape
    assert jnp.allclose(logits, ref, atol=5e-4, rtol=1e-3), (logits, ref)
    print("KERNEL_OK")
</pallas_src>

<mosaic_0001>
module attributes {stable_mosaic.version = 11 : i64} {
  func.func @bert_classifier_head_kernel(%arg0: i32, %arg1: memref<2x1xi32, #tpu.memory_space<vmem>>, %arg2: memref<2x8x128xbf16, #tpu.memory_space<vmem>>, %arg3: memref<128x128xbf16, #tpu.memory_space<vmem>>, %arg4: memref<1x128xf32, #tpu.memory_space<vmem>>, %arg5: memref<128x128xbf16, #tpu.memory_space<vmem>>, %arg6: memref<1x128xf32, #tpu.memory_space<vmem>>, %arg7: memref<2x128xf32, #tpu.memory_space<vmem>>) attributes {dimension_semantics = [#tpu.dimension_semantics<parallel>], iteration_bounds = array<i64: 1>, scalar_prefetch = 0 : i64, scratch_operands = 0 : i64, tpu.core_type = #tpu.core_type<tc>, window_params = [{transform_indices = @transform_0, window_bounds = array<i64: 2, 1>}, {transform_indices = @transform_1, window_bounds = array<i64: 2, 8, 128>}, {pipeline_mode = #tpu.pipeline_mode<synchronous>, transform_indices = @transform_2, window_bounds = array<i64: 128, 128>}, {pipeline_mode = #tpu.pipeline_mode<synchronous>, transform_indices = @transform_3, window_bounds = array<i64: 1, 128>}, {pipeline_mode = #tpu.pipeline_mode<synchronous>, transform_indices = @transform_4, window_bounds = array<i64: 128, 128>}, {pipeline_mode = #tpu.pipeline_mode<synchronous>, transform_indices = @transform_5, window_bounds = array<i64: 1, 128>}, {transform_indices = @transform_6, window_bounds = array<i64: 2, 128>}]} {
    %0 = tpu.iota {dimensions = array<i32: 1>} : vector<2x8xi32>
    %c0 = arith.constant 0 : index
    %c0_0 = arith.constant 0 : index
    %1 = vector.load %arg1[%c0, %c0_0] : memref<2x1xi32, #tpu.memory_space<vmem>>, vector<2x1xi32>
    %2 = vector.broadcast %1 : vector<2x1xi32> to vector<2x8xi32>
    %3 = arith.cmpi slt, %0, %2 : vector<2x8xi32>
    %4 = arith.extui %3 : vector<2x8xi1> to vector<2x8xi32>
    %5 = arith.sitofp %4 : vector<2x8xi32> to vector<2x8xf32>
    %6 = arith.truncf %5 : vector<2x8xf32> to vector<2x8xbf16>
    %c0_1 = arith.constant 0 : index
    %c0_2 = arith.constant 0 : index
    %c0_3 = arith.constant 0 : index
    %7 = vector.load %arg2[%c0_1, %c0_2, %c0_3] : memref<2x8x128xbf16, #tpu.memory_space<vmem>>, vector<2x8x128xbf16>
    %8 = vector.shape_cast %6 : vector<2x8xbf16> to vector<2x1x8xbf16>
    %cst = arith.constant dense<0.000000e+00> : vector<2x1x128xf32>
    %9 = tpu.matmul %8, %7, %cst {dimension_numbers = #tpu.dot_dimension_numbers<[2], [1], [1], [2], [0, 0, 0, 1, 1, 2], [0], [0]>} : vector<2x1x8xbf16>, vector<2x8x128xbf16>, vector<2x1x128xf32> -> vector<2x1x128xf32>
    %10 = vector.shape_cast %9 : vector<2x1x128xf32> to vector<2x128xf32>
    %c1_i32 = arith.constant 1 : i32
    %c8_i32 = arith.constant 8 : i32
    %11 = vector.broadcast %c1_i32 : i32 to vector<2x1xi32>
    %12 = arith.maxsi %11, %1 : vector<2x1xi32>
    %13 = vector.broadcast %c8_i32 : i32 to vector<2x1xi32>
    %14 = arith.minsi %13, %12 : vector<2x1xi32>
    %15 = arith.sitofp %14 : vector<2x1xi32> to vector<2x1xf32>
    %cst_4 = arith.constant 1.000000e+00 : f32
    %16 = vector.broadcast %cst_4 : f32 to vector<2x1xf32>
    %17 = arith.divf %16, %15 : vector<2x1xf32>
    %18 = vector.broadcast %17 : vector<2x1xf32> to vector<2x128xf32>
    %19 = arith.mulf %10, %18 : vector<2x128xf32>
    %20 = arith.truncf %19 : vector<2x128xf32> to vector<2x128xbf16>
    %c0_5 = arith.constant 0 : index
    %c0_6 = arith.constant 0 : index
    %21 = vector.load %arg3[%c0_5, %c0_6] : memref<128x128xbf16, #tpu.memory_space<vmem>>, vector<128x128xbf16>
    %cst_7 = arith.constant dense<0.000000e+00> : vector<2x128xf32>
    %22 = tpu.matmul %20, %21, %cst_7 {dimension_numbers = #tpu.dot_dimension_numbers<[1], [0], [0], [1], [0, 0, 1, 1], [], []>} : vector<2x128xbf16>, vector<128x128xbf16>, vector<2x128xf32> -> vector<2x128xf32>
    %c0_8 = arith.constant 0 : index
    %c0_9 = arith.constant 0 : index
    %23 = vector.load %arg4[%c0_8, %c0_9] : memref<1x128xf32, #tpu.memory_space<vmem>>, vector<1x128xf32>
    %24 = vector.broadcast %23 : vector<1x128xf32> to vector<2x128xf32>
    %25 = arith.addf %22, %24 : vector<2x128xf32>
    %26 = math.tanh %25 : vector<2x128xf32>
    %27 = arith.truncf %26 : vector<2x128xf32> to vector<2x128xbf16>
    %c0_10 = arith.constant 0 : index
    %c0_11 = arith.constant 0 : index
    %28 = vector.load %arg5[%c0_10, %c0_11] : memref<128x128xbf16, #tpu.memory_space<vmem>>, vector<128x128xbf16>
    %cst_12 = arith.constant dense<0.000000e+00> : vector<2x128xf32>
    %29 = tpu.matmul %27, %28, %cst_12 {dimension_numbers = #tpu.dot_dimension_numbers<[1], [0], [0], [1], [0, 0, 1, 1], [], []>} : vector<2x128xbf16>, vector<128x128xbf16>, vector<2x128xf32> -> vector<2x128xf32>
    %c0_13 = arith.constant 0 : index
    %c0_14 = arith.constant 0 : index
    %30 = vector.load %arg6[%c0_13, %c0_14] : memref<1x128xf32, #tpu.memory_space<vmem>>, vector<1x128xf32>
    %31 = vector.broadcast %30 : vector<1x128xf32> to vector<2x128xf32>
    %32 = arith.addf %29, %31 : vector<2x128xf32>
    %c0_15 = arith.constant 0 : index
    %c0_16 = arith.constant 0 : index
    %33 = vector.load %arg7[%c0_15, %c0_16] : memref<2x128xf32, #tpu.memory_space<vmem>>, vector<2x128xf32>
    tpu.vector_store %arg7[%c0_15, %c0_16], %32 {strides = array<i32>} : memref<2x128xf32, #tpu.memory_space<vmem>>, vector<2x128xf32>,
    return
  }
  func.func @transform_0(%arg0: i32) -> (i32, i32) {
    %c0_i32 = arith.constant 0 : i32
    %c0_i32_0 = arith.constant 0 : i32
    return %arg0, %c0_i32 : i32, i32
  }
  func.func @transform_1(%arg0: i32) -> (i32, i32, i32) {
    %c0_i32 = arith.constant 0 : i32
    %c0_i32_0 = arith.constant 0 : i32
    %c0_i32_1 = arith.constant 0 : i32
    return %arg0, %c0_i32, %c0_i32_0 : i32, i32, i32
  }
  func.func @transform_2(%arg0: i32) -> (i32, i32) {
    %c0_i32 = arith.constant 0 : i32
    %c0_i32_0 = arith.constant 0 : i32
    %c0_i32_1 = arith.constant 0 : i32
    return %c0_i32, %c0_i32_0 : i32, i32
  }
  func.func @transform_3(%arg0: i32) -> (i32, i32) {
    %c0_i32 = arith.constant 0 : i32
    %c0_i32_0 = arith.constant 0 : i32
    %c0_i32_1 = arith.constant 0 : i32
    return %c0_i32, %c0_i32_0 : i32, i32
  }
  func.func @transform_4(%arg0: i32) -> (i32, i32) {
    %c0_i32 = arith.constant 0 : i32
    %c0_i32_0 = arith.constant 0 : i32
    %c0_i32_1 = arith.constant 0 : i32
    return %c0_i32, %c0_i32_0 : i32, i32
  }
  func.func @transform_5(%arg0: i32) -> (i32, i32) {
    %c0_i32 = arith.constant 0 : i32
    %c0_i32_0 = arith.constant 0 : i32
    %c0_i32_1 = arith.constant 0 : i32
    return %c0_i32, %c0_i32_0 : i32, i32
  }
  func.func @transform_6(%arg0: i32) -> (i32, i32) {
    %c0_i32 = arith.constant 0 : i32
    %c0_i32_0 = arith.constant 0 : i32
    return %arg0, %c0_i32 : i32, i32
  }
}

module attributes {stable_mosaic.version = 11 : i64} {
  func.func @bert_classifier_head_kernel(%arg0: i32, %arg1: memref<2x1xi32, #tpu.memory_space<vmem>>, %arg2: memref<2x8x128xbf16, #tpu.memory_space<vmem>>, %arg3: memref<128x128xbf16, #tpu.memory_space<vmem>>, %arg4: memref<1x128xf32, #tpu.memory_space<vmem>>, %arg5: memref<128x128xbf16, #tpu.memory_space<vmem>>, %arg6: memref<1x128xf32, #tpu.memory_space<vmem>>, %arg7: memref<2x128xf32, #tpu.memory_space<vmem>>) attributes {dimension_semantics = [#tpu.dimension_semantics<parallel>], iteration_bounds = array<i64: 1>, scalar_prefetch = 0 : i64, scratch_operands = 0 : i64, tpu.core_type = #tpu.core_type<tc>, window_params = [{transform_indices = @transform_0, window_bounds = array<i64: 2, 1>}, {transform_indices = @transform_1, window_bounds = array<i64: 2, 8, 128>}, {pipeline_mode = #tpu.pipeline_mode<synchronous>, transform_indices = @transform_2, window_bounds = array<i64: 128, 128>}, {pipeline_mode = #tpu.pipeline_mode<synchronous>, transform_indices = @transform_3, window_bounds = array<i64: 1, 128>}, {pipeline_mode = #tpu.pipeline_mode<synchronous>, transform_indices = @transform_4, window_bounds = array<i64: 128, 128>}, {pipeline_mode = #tpu.pipeline_mode<synchronous>, transform_indices = @transform_5, window_bounds = array<i64: 1, 128>}, {transform_indices = @transform_6, window_bounds = array<i64: 2, 128>}]} {
    %0 = tpu.iota {dimensions = array<i32: 1>} : vector<2x8xi32>
    %c0 = arith.constant 0 : index
    %c0_0 = arith.constant 0 : index
    %1 = vector.load %arg1[%c0, %c0_0] : memref<2x1xi32, #tpu.memory_space<vmem>>, vector<2x1xi32>
    %2 = vector.broadcast %1 : vector<2x1xi32> to vector<2x8xi32>
    %3 = arith.cmpi slt, %0, %2 : vector<2x8xi32>
    %4 = arith.extui %3 : vector<2x8xi1> to vector<2x8xi32>
    %5 = arith.sitofp %4 : vector<2x8xi32> to vector<2x8xf32>
    %6 = arith.truncf %5 : vector<2x8xf32> to vector<2x8xbf16>
    %c0_1 = arith.constant 0 : index
    %c0_2 = arith.constant 0 : index
    %c0_3 = arith.constant 0 : index
    %7 = vector.load %arg2[%c0_1, %c0_2, %c0_3] : memref<2x8x128xbf16, #tpu.memory_space<vmem>>, vector<2x8x128xbf16>
    %8 = vector.shape_cast %6 : vector<2x8xbf16> to vector<2x1x8xbf16>
    %cst = arith.constant dense<0.000000e+00> : vector<2x1x128xf32>
    %9 = tpu.matmul %8, %7, %cst {dimension_numbers = #tpu.dot_dimension_numbers<[2], [1], [1], [2], [0, 0, 0, 1, 1, 2], [0], [0]>} : vector<2x1x8xbf16>, vector<2x8x128xbf16>, vector<2x1x128xf32> -> vector<2x1x128xf32>
    %10 = vector.shape_cast %9 : vector<2x1x128xf32> to vector<2x128xf32>
    %c1_i32 = arith.constant 1 : i32
    %c8_i32 = arith.constant 8 : i32
    %11 = vector.broadcast %c1_i32 : i32 to vector<2x1xi32>
    %12 = arith.maxsi %11, %1 : vector<2x1xi32>
    %13 = vector.broadcast %c8_i32 : i32 to vector<2x1xi32>
    %14 = arith.minsi %13, %12 : vector<2x1xi32>
    %15 = arith.sitofp %14 : vector<2x1xi32> to vector<2x1xf32>
    %cst_4 = arith.constant 1.000000e+00 : f32
    %16 = vector.broadcast %cst_4 : f32 to vector<2x1xf32>
    %17 = arith.divf %16, %15 : vector<2x1xf32>
    %18 = vector.broadcast %17 : vector<2x1xf32> to vector<2x128xf32>
    %19 = arith.mulf %10, %18 : vector<2x128xf32>
    %20 = arith.truncf %19 : vector<2x128xf32> to vector<2x128xbf16>
    %c0_5 = arith.constant 0 : index
    %c0_6 = arith.constant 0 : index
    %21 = vector.load %arg3[%c0_5, %c0_6] : memref<128x128xbf16, #tpu.memory_space<vmem>>, vector<128x128xbf16>
    %cst_7 = arith.constant dense<0.000000e+00> : vector<2x128xf32>
    %22 = tpu.matmul %20, %21, %cst_7 {dimension_numbers = #tpu.dot_dimension_numbers<[1], [0], [0], [1], [0, 0, 1, 1], [], []>} : vector<2x128xbf16>, vector<128x128xbf16>, vector<2x128xf32> -> vector<2x128xf32>
    %c0_8 = arith.constant 0 : index
    %c0_9 = arith.constant 0 : index
    %23 = vector.load %arg4[%c0_8, %c0_9] : memref<1x128xf32, #tpu.memory_space<vmem>>, vector<1x128xf32>
    %24 = vector.broadcast %23 : vector<1x128xf32> to vector<2x128xf32>
    %25 = arith.addf %22, %24 : vector<2x128xf32>
    %26 = math.tanh %25 : vector<2x128xf32>
    %27 = arith.truncf %26 : vector<2x128xf32> to vector<2x128xbf16>
    %c0_10 = arith.constant 0 : index
    %c0_11 = arith.constant 0 : index
    %28 = vector.load %arg5[%c0_10, %c0_11] : memref<128x128xbf16, #tpu.memory_space<vmem>>, vector<128x128xbf16>
    %cst_12 = arith.constant dense<0.000000e+00> : vector<2x128xf32>
    %29 = tpu.matmul %27, %28, %cst_12 {dimension_numbers = #tpu.dot_dimension_numbers<[1], [0], [0], [1], [0, 0, 1, 1], [], []>} : vector<2x128xbf16>, vector<128x128xbf16>, vector<2x128xf32> -> vector<2x128xf32>
    %c0_13 = arith.constant 0 : index
    %c0_14 = arith.constant 0 : index
    %30 = vector.load %arg6[%c0_13, %c0_14] : memref<1x128xf32, #tpu.memory_space<vmem>>, vector<1x128xf32>
    %31 = vector.broadcast %30 : vector<1x128xf32> to vector<2x128xf32>
    %32 = arith.addf %29, %31 : vector<2x128xf32>
    %c0_15 = arith.constant 0 : index
    %c0_16 = arith.constant 0 : index
    %33 = vector.load %arg7[%c0_15, %c0_16] : memref<2x128xf32, #tpu.memory_space<vmem>>, vector<2x128xf32>
    tpu.vector_store %arg7[%c0_15, %c0_16], %32 {strides = array<i32>} : memref<2x128xf32, #tpu.memory_space<vmem>>, vector<2x128xf32>,
    return
  }
  func.func @transform_0(%arg0: i32) -> (i32, i32) {
    %c0_i32 = arith.constant 0 : i32
    %c0_i32_0 = arith.constant 0 : i32
    return %arg0, %c0_i32 : i32, i32
  }
  func.func @transform_1(%arg0: i32) -> (i32, i32, i32) {
    %c0_i32 = arith.constant 0 : i32
    %c0_i32_0 = arith.constant 0 : i32
    %c0_i32_1 = arith.constant 0 : i32
    return %arg0, %c0_i32, %c0_i32_0 : i32, i32, i32
  }
  func.func @transform_2(%arg0: i32) -> (i32, i32) {
    %c0_i32 = arith.constant 0 : i32
    %c0_i32_0 = arith.constant 0 : i32
    %c0_i32_1 = arith.constant 0 : i32
    return %c0_i32, %c0_i32_0 : i32, i32
  }
  func.func @transform_3(%arg0: i32) -> (i32, i32) {
    %c0_i32 = arith.constant 0 : i32
    %c0_i32_0 = arith.constant 0 : i32
    %c0_i32_1 = arith.constant 0 : i32
    return %c0_i32, %c0_i32_0 : i32, i32
  }
  func.func @transform_4(%arg0: i32) -> (i32, i32) {
    %c0_i32 = arith.constant 0 : i32
    %c0_i32_0 = arith.constant 0 : i32
    %c0_i32_1 = arith.constant 0 : i32
    return %c0_i32, %c0_i32_0 : i32, i32
  }
  func.func @transform_5(%arg0: i32) -> (i32, i32) {
    %c0_i32 = arith.constant 0 : i32
    %c0_i32_0 = arith.constant 0 : i32
    %c0_i32_1 = arith.constant 0 : i32
    return %c0_i32, %c0_i32_0 : i32, i32
  }
  func.func @transform_6(%arg0: i32) -> (i32, i32) {
    %c0_i32 = arith.constant 0 : i32
    %c0_i32_0 = arith.constant 0 : i32
    return %arg0, %c0_i32 : i32, i32
  }
}

</mosaic_0001>

<bundles_post_ra>
// kernel: tpu_custom_call.1
= control target key start
LH: loop header
LB: loop body
LE: loop exit
PB: predicated region body
PF: predicated region fallthrough
CT: control target
= control target key end

     0   :  { %11 = vsyncpa [#allocation3], 0  ;;  %s833_s0 = inlined_call_operand.vmem [shape: s32[2,1], index: 0, kind: input, shape index: {}]   ;;  %s834_s1 = inlined_call_operand.hbm [shape: bf16[2,8,128], index: 1, kind: input, shape index: {}]   ;;  %s835_s2 = inlined_call_operand.hbm [shape: bf16[128,128], index: 2, kind: input, shape index: {}]   ;;  %s836_s3 = inlined_call_operand.vmem [shape: f32[1,128], index: 3, kind: input, shape index: {}]   ;;  %s837_s4 = inlined_call_operand.hbm [shape: bf16[128,128], index: 4, kind: input, shape index: {}]   ;;  %s838_s5 = inlined_call_operand.vmem [shape: f32[1,128], index: 5, kind: input, shape index: {}]   ;;  %s839_s6 = inlined_call_operand.hbm [shape: f32[2,128], index: 6, kind: output, shape index: {}]  }
   0x1   :  { %12 = vsyncpa [#allocation6], 0 }
   0x2   :  { %13 = vsyncpa [#allocation4], 0  ;;  %s688_s21 = smov [#allocation5]   ;;  %s689_s23 = smov [#allocation2]  }
   0x3   :  { %s33_s22 = sshll.u32 %s688_s21, 4  ;;  %s21_s24 = sshll.u32 %s689_s23, 4  ;;  %s34_s22 = int_to_ptr.vmem [resolvable:$true] %s33_s22  ;;  %s733_s24 = int_to_ptr.vmem [resolvable:$true] %s21_s24 }
   0x4   :  { %s594_s27 = scalar_lea.hbm %s835_s2, 1024 }
   0x5   :  { %p595_p0 = scmp.ne.s32.totalorder %s835_s2, %s594_s27  ;;  %p598_p1 = scmp.lt.u32.totalorder %s594_s27, %s835_s2 }
   0x7   :  { %p600_p2 = pnand %p598_p1, %p595_p0 }
   0x9   :  { %603 = shalt.err (!%p600_p2)
}
   0xa   :  { %s604_s8 = scalar_lea.vmem %s34_s22, 1024  ;;  %p609_p4 = scmp.lt.s32.totalorder %s34_s22, %s34_s22 }
   0xb   :  { %p605_p3 = scmp.ne.s32.totalorder %s34_s22, %s604_s8  ;;  %p610_p5 = scmp.lt.s32.totalorder %s604_s8, %s604_s8 }
   0xd   :  { %p611_p6 = por %p610_p5, %p609_p4 }
   0xf   :  { %p612_p7 = pnand %p611_p6, %p605_p3 }
  0x11   :  { %615 = shalt.err (!%p612_p7)
}
  0x12   :  { %s690_s9 = smov 64   ;;  %s691_s10 = smov 4  }
  0x13   :  { %39 = dma.hbm_to_vmem [thread:$0]  %s835_s2, 1024, %s34_s22, [#allocation6], %s690_s9, %s690_s9, %s691_s10  }
  0x14   :  { %s616_s15 = scalar_lea.hbm %s834_s1, 128 }
  0x15   :  { %p617_p8 = scmp.ne.s32.totalorder %s834_s1, %s616_s15  ;;  %p620_p9 = scmp.lt.u32.totalorder %s616_s15, %s834_s1 }
  0x17   :  { %p622_p10 = pnand %p620_p9, %p617_p8 }
  0x19   :  { %625 = shalt.err (!%p622_p10)
}
  0x1a   :  { %s626_s20 = scalar_lea.vmem %s733_s24, 128  ;;  %p631_p12 = scmp.lt.s32.totalorder %s733_s24, %s733_s24 }
  0x1b   :  { %p627_p11 = scmp.ne.s32.totalorder %s733_s24, %s626_s20  ;;  %p632_p13 = scmp.lt.s32.totalorder %s626_s20, %s626_s20 }
  0x1d   :  { %p633_p0 = por %p632_p13, %p631_p12 }
  0x1f   :  { %p634_p1 = pnand %p633_p0, %p627_p11 }
  0x21   :  { %637 = shalt.err (!%p634_p1)
}
  0x22   :  { %27 = dma.hbm_to_vmem [thread:$0]  %s834_s1, 128, %s733_s24, [#allocation3], %s690_s9, %s690_s9, %s691_s10  }
  0x23   :  { %s692_s22 = smov [#allocation7]   ;;  %s638_s27 = scalar_lea.hbm %s837_s4, 1024 }
  0x24   :  { %s47_s23 = sshll.u32 %s692_s22, 4  ;;  %p639_p2 = scmp.ne.s32.totalorder %s837_s4, %s638_s27  ;;  %s48_s23 = int_to_ptr.vmem [resolvable:$true] %s47_s23 }
  0x25   :  { %p642_p3 = scmp.lt.u32.totalorder %s638_s27, %s837_s4 }
  0x27   :  { %p644_p4 = pnand %p642_p3, %p639_p2 }
  0x29   :  { %647 = shalt.err (!%p644_p4)
}
  0x2a   :  { %s648_s8 = scalar_lea.vmem %s48_s23, 1024  ;;  %p653_p6 = scmp.lt.s32.totalorder %s48_s23, %s48_s23 }
  0x2b   :  { %p649_p5 = scmp.ne.s32.totalorder %s48_s23, %s648_s8  ;;  %p654_p7 = scmp.lt.s32.totalorder %s648_s8, %s648_s8 }
  0x2d   :  { %p655_p8 = por %p654_p7, %p653_p6 }
  0x2f   :  { %p656_p9 = pnand %p655_p8, %p649_p5 }
  0x31   :  { %659 = shalt.err (!%p656_p9)
}
  0x32   :  { %53 = dma.hbm_to_vmem [thread:$0]  %s837_s4, 1024, %s48_s23, [#allocation6], %s690_s9, %s690_s9, %s691_s10  }
  0x33   :  { %682 = dma.done.wait [#allocation3], 128  }
  0x34   :  { %683 = vsyncadd [#allocation3], 4294967168 }
  0x35   :  { %684 = dma.done.wait [#allocation6], 2048  }
  0x36   :  { %685 = vsyncadd [#allocation6], 4294965248  ;;  %v693_v0 = vmov 0   ;;  %v694_v1 = vmov 0.0   ;;  %v68_v2 = vld [vmem:[%s833_s0] sm:$0x3]  ;;  %v66_v11 = vlaneseq }
  0x37   :  { %573 = vset.pattern.permute.xlu0 %v693_v0  ;;  %511 = vmatprep.subr.bf16.mxu0 %v694_v1  ;;  %vm199_vm0 = vcmp.gt.s32.totalorder %v68_v2, 1  ;;  %v76_v6 = vld [vmem:[#allocation2] sm:$0xf]  ;;  %vm104_vm2 = vcmask 1043456   ;;  %v77_v8 = vld [vmem:[#allocation2 + $0x4] sm:$0xf] }
  0x38   :  { %517 = vmatprep.subr.bf16.mxu1 %v694_v1  ;;  %70 = vperm.xlu0 %573, %v68_v2   ;;  %v200_v3 = vsel %vm199_vm0, %v68_v2, 1  ;;  %v106_v7 = vsel %vm104_vm2, %v76_v6, 0  ;;  %v157_v9 = vsel %vm104_vm2, %v77_v8, 0  ;;  %vm695_vm3 = vmmov 0   ;;  %v574_v26 = vld [vmem:[#allocation5] sm:$0xff]   ;;  %v575_v30 = vld [vmem:[#allocation5 + $0x8] sm:$0xff]  }
  0x39   :  { %vm201_vm1 = vcmp.lt.s32.totalorder %v200_v3, 8  ;;  %512 = vmatpush3.bf16.msra.mxu0 %v106_v7  ;;  %513 = vmatprep.mubr.msk.bf16.mxu0 %vm695_vm3, %v694_v1  ;;  %v696_v12 = vmov 1966171168   ;;  %v67_v14 = vand.u32 127, %v66_v11  ;;  %v83_v16 = vshrl.u32 %v66_v11, 7  ;;  %v576_v31 = vld [vmem:[#allocation5 + $0x10] sm:$0xff]  }
  0x3a   :  { %v202_v4 = vsel %vm201_vm1, %v200_v3, 8  ;;  %523 = vmatprep.subr.bf16.mxu0 %v694_v1  ;;  %518 = vmatpush3.bf16.msra.mxu1 %v157_v9  ;;  %v80_v13 = vunpack.c.l.s4 %v696_v12  ;;  %vm100_vm5 = vcmask 64512   ;;  %v577_v32 = vld [vmem:[#allocation5 + $0x18] sm:$0xff]   ;;  %v578_v33 = vld [vmem:[#allocation5 + $0x20] sm:$0xff]   ;;  %v579_v34 = vld [vmem:[#allocation5 + $0x28] sm:$0xff]   ;;  %vm245_vm6 = vcmask 1041409  }
  0x3b   :  { %v203_v5 = vcvt.s32.f32 %v202_v4  ;;  %519 = vmatprep.mubr.msk.bf16.mxu1 %vm695_vm3, %v694_v1  ;;  %543 = vmatprep.subr.bf16.mxu1 %v694_v1  ;;  %v98_v22 = vsub.s32 0, %v83_v16  ;;  %v580_v35 = vld [vmem:[#allocation5 + $0x30] sm:$0xff]   ;;  %v581_v36 = vld [vmem:[#allocation5 + $0x38] sm:$0xff]   ;;  %v582_v37 = vld [vmem:[#allocation7] sm:$0xff]   ;;  %s697_s13 = smov [#allocation8]  }
  0x3c   :  { %v81_v15 = vunpack.c.0.s8 %v80_v13  ;;  %v583_v38 = vld [vmem:[#allocation7 + $0x8] sm:$0xff]   ;;  %v584_v39 = vld [vmem:[#allocation7 + $0x10] sm:$0xff]   ;;  %v585_v40 = vld [vmem:[#allocation7 + $0x18] sm:$0xff]   ;;  %s457_s14 = sshll.u32 %s697_s13, 4  ;;  %s458_s14 = int_to_ptr.vmem [resolvable:$true] %s457_s14 }
  0x3d   :  { %590 = vrcp.f32 %v203_v5  ;;  %v586_v60 = vld [vmem:[#allocation7 + $0x20] sm:$0xff]   ;;  %v587_v61 = vld [vmem:[#allocation7 + $0x28] sm:$0xff]   ;;  %v588_v62 = vld [vmem:[#allocation7 + $0x30] sm:$0xff]   ;;  %p665_p11 = scmp.lt.s32.totalorder %s458_s14, %s458_s14 }
  0x3e   :  { %v84_v18 = vsub.s32 %v81_v15, %v83_v16  ;;  %v589_v63 = vld [vmem:[#allocation7 + $0x38] sm:$0xff]  }
  0x3f   :  { %v471_v0 = vld [vmem:[%s836_s3] ss:$0 sm:$0xff]  ;;  %s660_s3 = scalar_lea.vmem %s458_s14, 32 }
  0x40   :  { %v480_v9 = vld [vmem:[%s838_s5] ss:$0 sm:$0xff]  ;;  %p661_p10 = scmp.ne.s32.totalorder %s458_s14, %s660_s3  ;;  %p666_p12 = scmp.lt.s32.totalorder %s660_s3, %s660_s3 }
  0x42   :  { %p667_p13 = por %p666_p12, %p665_p11 }
  0x44   :  { %p668_p0 = pnand %p667_p13, %p661_p10 }
  0x47   :  { %v591_v10 = vpop.eup %590 }
  0x48   :  { %208 = vperm.xlu0 %573, %v591_v10  }
  0xb7   :  { %v71_v17 = vpop.permute.xlu0 %70 }
  0xb8   :  { %vm72_vm4 = vcmp.lt.s32.totalorder %v67_v14, %v71_v17 }
  0xb9   :  { %v467_v19 = vsel %vm72_vm4, 1.0, %v694_v1 }
  0xba   :  { %v75_v20 = vpack.c.bf16 %v467_v19, %v467_v19 }
  0xbc   :  { %v85_v21 = vrot.slane %v75_v20, %v84_v18 }
  0xbe   :  { %v92_v23 = vrot.slane %v85_v21, %v84_v18 }
  0xc0   :  { %v94_v24 = vunpack.i.h.s16 %v92_v23  ;;  %v468_v25 = vpack.i.b16 %v92_v23, %v92_v23 }
  0xc2   :  { %v148_v27 = vpack.i.b16 %v94_v24, %v94_v24  ;;  %v99_v28 = vrot.slane %v468_v25, %v98_v22 }
  0xc4   :  { %514 = vmatmul.mubr.msk.bf16.vlgmr.msra.gmra.mrb[0].mxu0 %vm100_vm5, %v99_v28  ;;  %v152_v29 = vrot.slane %v148_v27, %v98_v22 }
  0xc5   :  { %524 = vmatpush3.bf16.msra.mxu0 %v574_v26  ;;  %539 = vmatprep.mubr.msk.bf16.mxu0 %vm695_vm3, %v694_v1 }
  0xc6   :  { %520 = vmatmul.mubr.msk.bf16.vlgmr.msra.gmra.mrb[0].mxu1 %vm100_vm5, %v152_v29  ;;  %525 = vmatprep.subr.bf16.mxu0 %v694_v1 }
  0xc7   :  { %559 = vmatprep.mubr.msk.bf16.mxu1 %vm695_vm3, %v694_v1  ;;  %544 = vmatpush3.bf16.msra.mxu1 %v582_v37  ;;  %v209_v41 = vpop.permute.xlu0 %208 }
  0xc8   :  { %545 = vmatprep.subr.bf16.mxu1 %v694_v1  ;;  %v210_v43 = vrot.slane %v209_v41, 1 }
  0xc9   :  { %526 = vmatpush3.bf16.msra.mxu0 %v575_v30 }
  0xca   :  { %527 = vmatprep.subr.bf16.mxu0 %v694_v1 }
  0xcb   :  { %546 = vmatpush3.bf16.msra.mxu1 %v583_v38 }
  0xcc   :  { %547 = vmatprep.subr.bf16.mxu1 %v694_v1 }
  0xcd   :  { %528 = vmatpush3.bf16.msra.mxu0 %v576_v31 }
  0xce   :  { %529 = vmatprep.subr.bf16.mxu0 %v694_v1 }
  0xcf   :  { %548 = vmatpush3.bf16.msra.mxu1 %v584_v39 }
  0xd0   :  { %549 = vmatprep.subr.bf16.mxu1 %v694_v1 }
  0xd1   :  { %530 = vmatpush3.bf16.msra.mxu0 %v577_v32 }
  0xd2   :  { %531 = vmatprep.subr.bf16.mxu0 %v694_v1 }
  0xd3   :  { %550 = vmatpush3.bf16.msra.mxu1 %v585_v40 }
  0xd4   :  { %551 = vmatprep.subr.bf16.mxu1 %v694_v1 }
  0xd5   :  { %532 = vmatpush3.bf16.msra.mxu0 %v578_v33 }
  0xd6   :  { %533 = vmatprep.subr.bf16.mxu0 %v694_v1 }
  0xd7   :  { %552 = vmatpush3.bf16.msra.mxu1 %v586_v60 }
  0xd8   :  { %553 = vmatprep.subr.bf16.mxu1 %v694_v1 }
  0xd9   :  { %534 = vmatpush3.bf16.msra.mxu0 %v579_v34 }
  0xda   :  { %535 = vmatprep.subr.bf16.mxu0 %v694_v1 }
  0xdb   :  { %554 = vmatpush3.bf16.msra.mxu1 %v587_v61 }
  0xdc   :  { %555 = vmatprep.subr.bf16.mxu1 %v694_v1 }
  0xdd   :  { %536 = vmatpush3.bf16.msra.mxu0 %v580_v35 }
  0xde   :  { %537 = vmatprep.subr.bf16.mxu0 %v694_v1 }
  0xdf   :  { %556 = vmatpush3.bf16.msra.mxu1 %v588_v62 }
  0xe0   :  { %557 = vmatprep.subr.bf16.mxu1 %v694_v1 }
  0xe1   :  { %538 = vmatpush3.bf16.msra.mxu0 %v581_v36 }
  0xe3   :  { %558 = vmatpush3.bf16.msra.mxu1 %v589_v63 }
 0x197   :  { %v142_v42 = vpop.f32.mrb[0].mxu0 }
 0x198   :  { %v213_v44 = vmul.f32 %v209_v41, %v142_v42  ;;  %v515_v45 = vpop.f32.mrb[1].mxu0 }
 0x199   :  { %v145_v46 = vpop.f32.mrb[2].mxu0  ;;  %v193_v47 = vpop.f32.mrb[0].mxu1 }
 0x19a   :  { %v214_v48 = vmul.f32 %v210_v43, %v193_v47  ;;  %v516_v49 = vpop.f32.mrb[3].mxu0  ;;  %v521_v50 = vpop.f32.mrb[1].mxu1  ;;  %v215_v52 = vpack.c.bf16 %v213_v44, %v213_v44 }
 0x19b   :  { %v196_v51 = vpop.f32.mrb[2].mxu1 }
 0x19c   :  { %v216_v53 = vpack.c.bf16 %v214_v48, %v214_v48  ;;  %v522_v54 = vpop.f32.mrb[3].mxu1  ;;  %v242_v56 = vunpack.c.l.b16 %v215_v52 }
 0x19e   :  { %v243_v55 = vunpack.c.l.b16 %v216_v53 }
 0x1a0   :  { %v244_v57 = vrot.slane %v243_v55, 7 }
 0x1a2   :  { %v246_v58 = vsel %vm245_vm6, %v244_v57, %v242_v56 }
 0x1a3   :  { %v247_v59 = vpack.c.b16 %v246_v58, %v246_v58 }
 0x1a5   :  { %540 = vmatmul.mubr.bf16.vlgmr.msra.gmra.mrb[4].mxu0 %v247_v59 }
 0x278   :  { %v331_v2 = vpop.f32.mrb[4].mxu0 }
 0x279   :  { %v332_v3 = vadd.f32 %v471_v0, %v331_v2  ;;  %v541_v4 = vpop.f32.mrb[5].mxu0 }
 0x27a   :  { %v334_v5 = vpop.f32.mrb[6].mxu0 }
 0x27b   :  { %592 = vtanh.f32 %v332_v3  ;;  %v542_v6 = vpop.f32.mrb[7].mxu0 }
 0x285   :  { %v593_v7 = vpop.eup %592 }
 0x286   :  { %v338_v8 = vpack.c.bf16 %v593_v7, %v593_v7 }
 0x288   :  { %560 = vmatmul.mubr.bf16.vlgmr.msra.gmra.mrb[4].mxu1 %v338_v8 }
 0x35b   :  { %v444_v1 = vpop.f32.mrb[4].mxu1 }
 0x35c   :  { %v445_v10 = vadd.f32 %v480_v9, %v444_v1  ;;  %v561_v11 = vpop.f32.mrb[5].mxu1 }
 0x35d   :  { %v447_v12 = vpop.f32.mrb[6].mxu1 }
 0x35e   :  { %450 = vst [vmem:[#allocation8] sm:$0x3] %v445_v10  ;;  %v562_v13 = vpop.f32.mrb[7].mxu1 }
 0x35f   :  { %671 = shalt.err (!%p668_p0)
}
 0x360   :  { %s672_s5 = scalar_lea.hbm %s839_s6, 32 }
 0x361   :  { %p673_p1 = scmp.ne.s32.totalorder %s839_s6, %s672_s5  ;;  %p676_p2 = scmp.lt.u32.totalorder %s672_s5, %s839_s6 }
 0x363   :  { %p678_p3 = pnand %p676_p2, %p673_p1 }
 0x365   :  { %681 = shalt.err (!%p678_p3)
}
 0x366   :  { %460 = dma.vmem_to_hbm [thread:$0]  %s458_s14, 32, %s839_s6, [#allocation4]  }
 0x367   :  { %686 = dma.done.wait [#allocation4], 32  }
 0x368   :  { %687 = vsyncadd [#allocation4], 4294967264 }
 0x369   :  { %464 = vsyncpa [#allocation3], 1 }
 0x36a   :  { %465 = vsyncpa [#allocation6], 1 }
 0x36b   :  { %466 = vsyncpa [#allocation4], 1 }

// kernel: tpu_custom_call.1
= control target key start
LH: loop header
LB: loop body
LE: loop exit
PB: predicated region body
PF: predicated region fallthrough
CT: control target
= control target key end

     0   :  { %11 = vsyncpa [#allocation3], 0  ;;  %s833_s0 = inlined_call_operand.vmem [shape: s32[2,1], index: 0, kind: input, shape index: {}]   ;;  %s834_s1 = inlined_call_operand.hbm [shape: bf16[2,8,128], index: 1, kind: input, shape index: {}]   ;;  %s835_s2 = inlined_call_operand.hbm [shape: bf16[128,128], index: 2, kind: input, shape index: {}]   ;;  %s836_s3 = inlined_call_operand.vmem [shape: f32[1,128], index: 3, kind: input, shape index: {}]   ;;  %s837_s4 = inlined_call_operand.hbm [shape: bf16[128,128], index: 4, kind: input, shape index: {}]   ;;  %s838_s5 = inlined_call_operand.vmem [shape: f32[1,128], index: 5, kind: input, shape index: {}]   ;;  %s839_s6 = inlined_call_operand.hbm [shape: f32[2,128], index: 6, kind: output, shape index: {}]  }
   0x1   :  { %12 = vsyncpa [#allocation6], 0 }
   0x2   :  { %13 = vsyncpa [#allocation4], 0  ;;  %s688_s21 = smov [#allocation5]   ;;  %s689_s23 = smov [#allocation2]  }
   0x3   :  { %s33_s22 = sshll.u32 %s688_s21, 4  ;;  %s21_s24 = sshll.u32 %s689_s23, 4  ;;  %s34_s22 = int_to_ptr.vmem [resolvable:$true] %s33_s22  ;;  %s733_s24 = int_to_ptr.vmem [resolvable:$true] %s21_s24 }
   0x4   :  { %s594_s27 = scalar_lea.hbm %s835_s2, 1024 }
   0x5   :  { %p595_p0 = scmp.ne.s32.totalorder %s835_s2, %s594_s27  ;;  %p598_p1 = scmp.lt.u32.totalorder %s594_s27, %s835_s2 }
   0x7   :  { %p600_p2 = pnand %p598_p1, %p595_p0 }
   0x9   :  { %603 = shalt.err (!%p600_p2)
}
   0xa   :  { %s604_s8 = scalar_lea.vmem %s34_s22, 1024  ;;  %p609_p4 = scmp.lt.s32.totalorder %s34_s22, %s34_s22 }
   0xb   :  { %p605_p3 = scmp.ne.s32.totalorder %s34_s22, %s604_s8  ;;  %p610_p5 = scmp.lt.s32.totalorder %s604_s8, %s604_s8 }
   0xd   :  { %p611_p6 = por %p610_p5, %p609_p4 }
   0xf   :  { %p612_p7 = pnand %p611_p6, %p605_p3 }
  0x11   :  { %615 = shalt.err (!%p612_p7)
}
  0x12   :  { %s690_s9 = smov 64   ;;  %s691_s10 = smov 4  }
  0x13   :  { %39 = dma.hbm_to_vmem [thread:$0]  %s835_s2, 1024, %s34_s22, [#allocation6], %s690_s9, %s690_s9, %s691_s10  }
  0x14   :  { %s616_s15 = scalar_lea.hbm %s834_s1, 128 }
  0x15   :  { %p617_p8 = scmp.ne.s32.totalorder %s834_s1, %s616_s15  ;;  %p620_p9 = scmp.lt.u32.totalorder %s616_s15, %s834_s1 }
  0x17   :  { %p622_p10 = pnand %p620_p9, %p617_p8 }
  0x19   :  { %625 = shalt.err (!%p622_p10)
}
  0x1a   :  { %s626_s20 = scalar_lea.vmem %s733_s24, 128  ;;  %p631_p12 = scmp.lt.s32.totalorder %s733_s24, %s733_s24 }
  0x1b   :  { %p627_p11 = scmp.ne.s32.totalorder %s733_s24, %s626_s20  ;;  %p632_p13 = scmp.lt.s32.totalorder %s626_s20, %s626_s20 }
  0x1d   :  { %p633_p0 = por %p632_p13, %p631_p12 }
  0x1f   :  { %p634_p1 = pnand %p633_p0, %p627_p11 }
  0x21   :  { %637 = shalt.err (!%p634_p1)
}
  0x22   :  { %27 = dma.hbm_to_vmem [thread:$0]  %s834_s1, 128, %s733_s24, [#allocation3], %s690_s9, %s690_s9, %s691_s10  }
  0x23   :  { %s692_s22 = smov [#allocation7]   ;;  %s638_s27 = scalar_lea.hbm %s837_s4, 1024 }
  0x24   :  { %s47_s23 = sshll.u32 %s692_s22, 4  ;;  %p639_p2 = scmp.ne.s32.totalorder %s837_s4, %s638_s27  ;;  %s48_s23 = int_to_ptr.vmem [resolvable:$true] %s47_s23 }
  0x25   :  { %p642_p3 = scmp.lt.u32.totalorder %s638_s27, %s837_s4 }
  0x27   :  { %p644_p4 = pnand %p642_p3, %p639_p2 }
  0x29   :  { %647 = shalt.err (!%p644_p4)
}
  0x2a   :  { %s648_s8 = scalar_lea.vmem %s48_s23, 1024  ;;  %p653_p6 = scmp.lt.s32.totalorder %s48_s23, %s48_s23 }
  0x2b   :  { %p649_p5 = scmp.ne.s32.totalorder %s48_s23, %s648_s8  ;;  %p654_p7 = scmp.lt.s32.totalorder %s648_s8, %s648_s8 }
  0x2d   :  { %p655_p8 = por %p654_p7, %p653_p6 }
  0x2f   :  { %p656_p9 = pnand %p655_p8, %p649_p5 }
  0x31   :  { %659 = shalt.err (!%p656_p9)
}
  0x32   :  { %53 = dma.hbm_to_vmem [thread:$0]  %s837_s4, 1024, %s48_s23, [#allocation6], %s690_s9, %s690_s9, %s691_s10  }
  0x33   :  { %682 = dma.done.wait [#allocation3], 128  }
  0x34   :  { %683 = vsyncadd [#allocation3], 4294967168 }
  0x35   :  { %684 = dma.done.wait [#allocation6], 2048  }
  0x36   :  { %685 = vsyncadd [#allocation6], 4294965248  ;;  %v693_v0 = vmov 0   ;;  %v694_v1 = vmov 0.0   ;;  %v68_v2 = vld [vmem:[%s833_s0] sm:$0x3]  ;;  %v66_v11 = vlaneseq }
  0x37   :  { %573 = vset.pattern.permute.xlu0 %v693_v0  ;;  %511 = vmatprep.subr.bf16.mxu0 %v694_v1  ;;  %vm199_vm0 = vcmp.gt.s32.totalorder %v68_v2, 1  ;;  %v76_v6 = vld [vmem:[#allocation2] sm:$0xf]  ;;  %vm104_vm2 = vcmask 1043456   ;;  %v77_v8 = vld [vmem:[#allocation2 + $0x4] sm:$0xf] }
  0x38   :  { %517 = vmatprep.subr.bf16.mxu1 %v694_v1  ;;  %70 = vperm.xlu0 %573, %v68_v2   ;;  %v200_v3 = vsel %vm199_vm0, %v68_v2, 1  ;;  %v106_v7 = vsel %vm104_vm2, %v76_v6, 0  ;;  %v157_v9 = vsel %vm104_vm2, %v77_v8, 0  ;;  %vm695_vm3 = vmmov 0   ;;  %v574_v26 = vld [vmem:[#allocation5] sm:$0xff]   ;;  %v575_v30 = vld [vmem:[#allocation5 + $0x8] sm:$0xff]  }
  0x39   :  { %vm201_vm1 = vcmp.lt.s32.totalorder %v200_v3, 8  ;;  %512 = vmatpush3.bf16.msra.mxu0 %v106_v7  ;;  %513 = vmatprep.mubr.msk.bf16.mxu0 %vm695_vm3, %v694_v1  ;;  %v696_v12 = vmov 1966171168   ;;  %v67_v14 = vand.u32 127, %v66_v11  ;;  %v83_v16 = vshrl.u32 %v66_v11, 7  ;;  %v576_v31 = vld [vmem:[#allocation5 + $0x10] sm:$0xff]  }
  0x3a   :  { %v202_v4 = vsel %vm201_vm1, %v200_v3, 8  ;;  %523 = vmatprep.subr.bf16.mxu0 %v694_v1  ;;  %518 = vmatpush3.bf16.msra.mxu1 %v157_v9  ;;  %v80_v13 = vunpack.c.l.s4 %v696_v12  ;;  %vm100_vm5 = vcmask 64512   ;;  %v577_v32 = vld [vmem:[#allocation5 + $0x18] sm:$0xff]   ;;  %v578_v33 = vld [vmem:[#allocation5 + $0x20] sm:$0xff]   ;;  %v579_v34 = vld [vmem:[#allocation5 + $0x28] sm:$0xff]   ;;  %vm245_vm6 = vcmask 1041409  }
  0x3b   :  { %v203_v5 = vcvt.s32.f32 %v202_v4  ;;  %519 = vmatprep.mubr.msk.bf16.mxu1 %vm695_vm3, %v694_v1  ;;  %543 = vmatprep.subr.bf16.mxu1 %v694_v1  ;;  %v98_v22 = vsub.s32 0, %v83_v16  ;;  %v580_v35 = vld [vmem:[#allocation5 + $0x30] sm:$0xff]   ;;  %v581_v36 = vld [vmem:[#allocation5 + $0x38] sm:$0xff]   ;;  %v582_v37 = vld [vmem:[#allocation7] sm:$0xff]   ;;  %s697_s13 = smov [#allocation8]  }
  0x3c   :  { %v81_v15 = vunpack.c.0.s8 %v80_v13  ;;  %v583_v38 = vld [vmem:[#allocation7 + $0x8] sm:$0xff]   ;;  %v584_v39 = vld [vmem:[#allocation7 + $0x10] sm:$0xff]   ;;  %v585_v40 = vld [vmem:[#allocation7 + $0x18] sm:$0xff]   ;;  %s457_s14 = sshll.u32 %s697_s13, 4  ;;  %s458_s14 = int_to_ptr.vmem [resolvable:$true] %s457_s14 }
  0x3d   :  { %590 = vrcp.f32 %v203_v5  ;;  %v586_v60 = vld [vmem:[#allocation7 + $0x20] sm:$0xff]   ;;  %v587_v61 = vld [vmem:[#allocation7 + $0x28] sm:$0xff]   ;;  %v588_v62 = vld [vmem:[#allocation7 + $0x30] sm:$0xff]   ;;  %p665_p11 = scmp.lt.s32.totalorder %s458_s14, %s458_s14 }
  0x3e   :  { %v84_v18 = vsub.s32 %v81_v15, %v83_v16  ;;  %v589_v63 = vld [vmem:[#allocation7 + $0x38] sm:$0xff]  }
  0x3f   :  { %v471_v0 = vld [vmem:[%s836_s3] ss:$0 sm:$0xff]  ;;  %s660_s3 = scalar_lea.vmem %s458_s14, 32 }
  0x40   :  { %v480_v9 = vld [vmem:[%s838_s5] ss:$0 sm:$0xff]  ;;  %p661_p10 = scmp.ne.s32.totalorder %s458_s14, %s660_s3  ;;  %p666_p12 = scmp.lt.s32.totalorder %s660_s3, %s660_s3 }
  0x42   :  { %p667_p13 = por %p666_p12, %p665_p11 }
  0x44   :  { %p668_p0 = pnand %p667_p13, %p661_p10 }
  0x47   :  { %v591_v10 = vpop.eup %590 }
  0x48   :  { %208 = vperm.xlu0 %573, %v591_v10  }
  0xb7   :  { %v71_v17 = vpop.permute.xlu0 %70 }
  0xb8   :  { %vm72_vm4 = vcmp.lt.s32.totalorder %v67_v14, %v71_v17 }
  0xb9   :  { %v467_v19 = vsel %vm72_vm4, 1.0, %v694_v1 }
  0xba   :  { %v75_v20 = vpack.c.bf16 %v467_v19, %v467_v19 }
  0xbc   :  { %v85_v21 = vrot.slane %v75_v20, %v84_v18 }
  0xbe   :  { %v92_v23 = vrot.slane %v85_v21, %v84_v18 }
  0xc0   :  { %v94_v24 = vunpack.i.h.s16 %v92_v23  ;;  %v468_v25 = vpack.i.b16 %v92_v23, %v92_v23 }
  0xc2   :  { %v148_v27 = vpack.i.b16 %v94_v24, %v94_v24  ;;  %v99_v28 = vrot.slane %v468_v25, %v98_v22 }
  0xc4   :  { %514 = vmatmul.mubr.msk.bf16.vlgmr.msra.gmra.mrb[0].mxu0 %vm100_vm5, %v99_v28  ;;  %v152_v29 = vrot.slane %v148_v27, %v98_v22 }
  0xc5   :  { %524 = vmatpush3.bf16.msra.mxu0 %v574_v26  ;;  %539 = vmatprep.mubr.msk.bf16.mxu0 %vm695_vm3, %v694_v1 }
  0xc6   :  { %520 = vmatmul.mubr.msk.bf16.vlgmr.msra.gmra.mrb[0].mxu1 %vm100_vm5, %v152_v29  ;;  %525 = vmatprep.subr.bf16.mxu0 %v694_v1 }
  0xc7   :  { %559 = vmatprep.mubr.msk.bf16.mxu1 %vm695_vm3, %v694_v1  ;;  %544 = vmatpush3.bf16.msra.mxu1 %v582_v37  ;;  %v209_v41 = vpop.permute.xlu0 %208 }
  0xc8   :  { %545 = vmatprep.subr.bf16.mxu1 %v694_v1  ;;  %v210_v43 = vrot.slane %v209_v41, 1 }
  0xc9   :  { %526 = vmatpush3.bf16.msra.mxu0 %v575_v30 }
  0xca   :  { %527 = vmatprep.subr.bf16.mxu0 %v694_v1 }
  0xcb   :  { %546 = vmatpush3.bf16.msra.mxu1 %v583_v38 }
  0xcc   :  { %547 = vmatprep.subr.bf16.mxu1 %v694_v1 }
  0xcd   :  { %528 = vmatpush3.bf16.msra.mxu0 %v576_v31 }
  0xce   :  { %529 = vmatprep.subr.bf16.mxu0 %v694_v1 }
  0xcf   :  { %548 = vmatpush3.bf16.msra.mxu1 %v584_v39 }
  0xd0   :  { %549 = vmatprep.subr.bf16.mxu1 %v694_v1 }
  0xd1   :  { %530 = vmatpush3.bf16.msra.mxu0 %v577_v32 }
  0xd2   :  { %531 = vmatprep.subr.bf16.mxu0 %v694_v1 }
  0xd3   :  { %550 = vmatpush3.bf16.msra.mxu1 %v585_v40 }
  0xd4   :  { %551 = vmatprep.subr.bf16.mxu1 %v694_v1 }
  0xd5   :  { %532 = vmatpush3.bf16.msra.mxu0 %v578_v33 }
  0xd6   :  { %533 = vmatprep.subr.bf16.mxu0 %v694_v1 }
  0xd7   :  { %552 = vmatpush3.bf16.msra.mxu1 %v586_v60 }
  0xd8   :  { %553 = vmatprep.subr.bf16.mxu1 %v694_v1 }
  0xd9   :  { %534 = vmatpush3.bf16.msra.mxu0 %v579_v34 }
  0xda   :  { %535 = vmatprep.subr.bf16.mxu0 %v694_v1 }
  0xdb   :  { %554 = vmatpush3.bf16.msra.mxu1 %v587_v61 }
  0xdc   :  { %555 = vmatprep.subr.bf16.mxu1 %v694_v1 }
  0xdd   :  { %536 = vmatpush3.bf16.msra.mxu0 %v580_v35 }
  0xde   :  { %537 = vmatprep.subr.bf16.mxu0 %v694_v1 }
  0xdf   :  { %556 = vmatpush3.bf16.msra.mxu1 %v588_v62 }
  0xe0   :  { %557 = vmatprep.subr.bf16.mxu1 %v694_v1 }
  0xe1   :  { %538 = vmatpush3.bf16.msra.mxu0 %v581_v36 }
  0xe3   :  { %558 = vmatpush3.bf16.msra.mxu1 %v589_v63 }
 0x197   :  { %v142_v42 = vpop.f32.mrb[0].mxu0 }
 0x198   :  { %v213_v44 = vmul.f32 %v209_v41, %v142_v42  ;;  %v515_v45 = vpop.f32.mrb[1].mxu0 }
 0x199   :  { %v145_v46 = vpop.f32.mrb[2].mxu0  ;;  %v193_v47 = vpop.f32.mrb[0].mxu1 }
 0x19a   :  { %v214_v48 = vmul.f32 %v210_v43, %v193_v47  ;;  %v516_v49 = vpop.f32.mrb[3].mxu0  ;;  %v521_v50 = vpop.f32.mrb[1].mxu1  ;;  %v215_v52 = vpack.c.bf16 %v213_v44, %v213_v44 }
 0x19b   :  { %v196_v51 = vpop.f32.mrb[2].mxu1 }
 0x19c   :  { %v216_v53 = vpack.c.bf16 %v214_v48, %v214_v48  ;;  %v522_v54 = vpop.f32.mrb[3].mxu1  ;;  %v242_v56 = vunpack.c.l.b16 %v215_v52 }
 0x19e   :  { %v243_v55 = vunpack.c.l.b16 %v216_v53 }
 0x1a0   :  { %v244_v57 = vrot.slane %v243_v55, 7 }
 0x1a2   :  { %v246_v58 = vsel %vm245_vm6, %v244_v57, %v242_v56 }
 0x1a3   :  { %v247_v59 = vpack.c.b16 %v246_v58, %v246_v58 }
 0x1a5   :  { %540 = vmatmul.mubr.bf16.vlgmr.msra.gmra.mrb[4].mxu0 %v247_v59 }
 0x278   :  { %v331_v2 = vpop.f32.mrb[4].mxu0 }
 0x279   :  { %v332_v3 = vadd.f32 %v471_v0, %v331_v2  ;;  %v541_v4 = vpop.f32.mrb[5].mxu0 }
 0x27a   :  { %v334_v5 = vpop.f32.mrb[6].mxu0 }
 0x27b   :  { %592 = vtanh.f32 %v332_v3  ;;  %v542_v6 = vpop.f32.mrb[7].mxu0 }
 0x285   :  { %v593_v7 = vpop.eup %592 }
 0x286   :  { %v338_v8 = vpack.c.bf16 %v593_v7, %v593_v7 }
 0x288   :  { %560 = vmatmul.mubr.bf16.vlgmr.msra.gmra.mrb[4].mxu1 %v338_v8 }
 0x35b   :  { %v444_v1 = vpop.f32.mrb[4].mxu1 }
 0x35c   :  { %v445_v10 = vadd.f32 %v480_v9, %v444_v1  ;;  %v561_v11 = vpop.f32.mrb[5].mxu1 }
 0x35d   :  { %v447_v12 = vpop.f32.mrb[6].mxu1 }
 0x35e   :  { %450 = vst [vmem:[#allocation8] sm:$0x3] %v445_v10  ;;  %v562_v13 = vpop.f32.mrb[7].mxu1 }
 0x35f   :  { %671 = shalt.err (!%p668_p0)
}
 0x360   :  { %s672_s5 = scalar_lea.hbm %s839_s6, 32 }
 0x361   :  { %p673_p1 = scmp.ne.s32.totalorder %s839_s6, %s672_s5  ;;  %p676_p2 = scmp.lt.u32.totalorder %s672_s5, %s839_s6 }
 0x363   :  { %p678_p3 = pnand %p676_p2, %p673_p1 }
 0x365   :  { %681 = shalt.err (!%p678_p3)
}
 0x366   :  { %460 = dma.vmem_to_hbm [thread:$0]  %s458_s14, 32, %s839_s6, [#allocation4]  }
 0x367   :  { %686 = dma.done.wait [#allocation4], 32  }
 0x368   :  { %687 = vsyncadd [#allocation4], 4294967264 }
 0x369   :  { %464 = vsyncpa [#allocation3], 1 }
 0x36a   :  { %465 = vsyncpa [#allocation6], 1 }
 0x36b   :  { %466 = vsyncpa [#allocation4], 1 }

</bundles_post_ra>
